<compile_context>
chip_gen: v7x
topology: tpu7x:2x2x1
jax: 0.10.0
libtpu: 0.0.40
codegen_flags: <defaults>
</compile_context>

<pallas_src>
import jax
import jax.numpy as jnp
from jax.experimental import pallas as pl
from jax.experimental.pallas import tpu as pltpu


def _sigmoid(z):
    # sigmoid(z) == 0.5 * (tanh(z / 2) + 1): a single EUP push per element
    # instead of exp + reciprocal.
    return 0.5 * jnp.tanh(0.5 * z) + 0.5


def _lstm_layer_kernel(x_ref, rec_ref, c0_ref, noise_ref, wih_ref, out_ref):
    """One grid step = one time tile of Tt timesteps for all B batch rows.

    x_ref:     (Tt, B, I)   input slice (native layout, no wrapper transpose)
    rec_ref:   (B, 4*Hp)    loop-invariant h0 @ W_hh^T + b_ih + b_hh (f32)
    c0_ref:    (B, Hp)      initial cell state (f32)
    noise_ref: (B, Hp)      additive cell noise (f32)
    wih_ref:   (I, 4*Hp)    W_ih^T (gate-padded, possibly bf16)
    out_ref:   (Tt, B, Hp)  per-step hidden outputs (caller dtype)
    """
    Hp = c0_ref.shape[-1]
    B = c0_ref.shape[0]
    w = wih_ref[...]                                    # resident weights

    # Static per-batch-row loop: each b is an independent 2D MXU matmul
    # (M=Tt, K=I, N=4Hp) plus lane-aligned elementwise gate math (all f32).
    # TODO(synk): for very large B fold this into a fori_loop / extra grid axis.
    for b in range(B):
        x_b = x_ref[:, b, :]                            # (Tt, I)
        gates = jnp.dot(x_b, w, preferred_element_type=jnp.float32)
        gates = gates + rec_ref[b:b + 1, :]             # (Tt,4Hp) + (1,4Hp)

        # Hp is a multiple of 128 -> every gate slice is a lane-aligned view.
        i_g = _sigmoid(gates[:, 0 * Hp:1 * Hp])
        f_g = _sigmoid(gates[:, 1 * Hp:2 * Hp])
        g_g = jnp.tanh(gates[:, 2 * Hp:3 * Hp])
        o_g = _sigmoid(gates[:, 3 * Hp:4 * Hp])

        c = f_g * c0_ref[b:b + 1, :] + i_g * g_g + noise_ref[b:b + 1, :]
        h = o_g * jnp.tanh(c)
        out_ref[:, b, :] = h.astype(out_ref.dtype)


def _round_up(v, m):
    return ((v + m - 1) // m) * m


def _pick_time_block(T, B, I, Hp, bytes_x, bytes_o, override=None,
                     stream_budget_bytes=8 * 2 ** 20):
    """Time-tile length: as large as a conservative VMEM budget allows
    (double-buffered x/out tiles + live gate intermediates), capped at 512.
    The 8 MiB default keeps the footprint v7x-safe (64 MiB physical VMEM)."""
    if override is not None:
        return int(override)
    per_step = 2 * B * (I * bytes_x + Hp * bytes_o) + 3 * 4 * Hp * 4
    tt = stream_budget_bytes // max(per_step, 1)
    tt = max(8, min(int(tt), 512))
    tt = min(tt, _round_up(T, 8))
    return max(8, (tt // 8) * 8)


def lstm_layer_forward(x, h0, c0, w_ih, w_hh, b_ih, b_hh, noise,
                       mxu_dtype=None, time_block=None):
    """x: (T, B, I); h0, c0, noise: (B, H); w_ih: (4H, I); w_hh: (4H, H);
    b_ih, b_hh: (4H,).

    mxu_dtype: optionally cast x / W_ih^T (e.g. jnp.bfloat16 — recommended on
    v6e/v7x) for native-rate MXU; accumulation and gate math stay f32.
    """
    T, B, I = x.shape
    H = h0.shape[-1]
    Hp = _round_up(H, 128)               # lane-aligned gate width
    pad_h = Hp - H
    f32 = jnp.float32
    out_dtype = x.dtype

    # ---- Glue (plain JAX, cheap): hoist the loop-invariant recurrent term
    # (the Python loop in LSTMLayer never carries state) and pad H per gate.
    w_ih_f = jnp.asarray(w_ih, f32)                                   # (4H, I)
    rec = (jnp.asarray(h0, f32) @ jnp.asarray(w_hh, f32).T
           + jnp.asarray(b_ih, f32) + jnp.asarray(b_hh, f32))         # (B, 4H)

    w_ih_t = w_ih_f.T                                                 # (I, 4H)
    if pad_h:
        w_ih_t = jnp.pad(w_ih_t.reshape(I, 4, H),
                         ((0, 0), (0, 0), (0, pad_h))).reshape(I, 4 * Hp)
        rec_p = jnp.pad(rec.reshape(B, 4, H),
                        ((0, 0), (0, 0), (0, pad_h))).reshape(B, 4 * Hp)
        c0_p = jnp.pad(jnp.asarray(c0, f32), ((0, 0), (0, pad_h)))
        noise_p = jnp.pad(jnp.asarray(noise, f32), ((0, 0), (0, pad_h)))
    else:
        rec_p = rec
        c0_p = jnp.asarray(c0, f32)
        noise_p = jnp.asarray(noise, f32)

    x_k = jnp.asarray(x)                 # native (T, B, I) — no transpose
    if mxu_dtype is not None:            # bf16 MXU operands (v6e/v7x native)
        x_k = x_k.astype(mxu_dtype)
        w_ih_t = w_ih_t.astype(mxu_dtype)

    bytes_x = jnp.dtype(x_k.dtype).itemsize
    bytes_o = jnp.dtype(out_dtype).itemsize
    Tt = _pick_time_block(T, B, I, Hp, bytes_x, bytes_o, time_block)
    T_pad = _round_up(T, Tt)
    if T_pad != T:                       # decouple tile size from awkward T
        x_k = jnp.pad(x_k, ((0, T_pad - T), (0, 0), (0, 0)))
    n_t = T_pad // Tt

    # Explicit scoped-VMEM limit: double-buffered streamed tiles + resident
    # constants + live gate intermediates, with headroom (clamped to be safe
    # on all of v5e/v6e/v7x).
    blk = Tt * B * (I * bytes_x + Hp * bytes_o)
    consts = I * 4 * Hp * bytes_x + B * (4 * Hp + 2 * Hp) * 4
    live = 3 * Tt * 4 * Hp * 4
    vmem_limit = int(min(max(2 * (blk + consts) + live, 32 * 2 ** 20),
                         64 * 2 ** 20))

    # NOTE: rec / c0 / noise / W_ih^T have constant block indices so they are
    # DMA'd once and stay resident; on v7x (64 MiB VMEM) they can additionally
    # be single-buffered (pipeline_mode=pl.Buffered(1)) to halve their footprint.
    out = pl.pallas_call(
        _lstm_layer_kernel,
        out_shape=jax.ShapeDtypeStruct((T_pad, B, Hp), out_dtype),
        grid=(n_t,),
        in_specs=[
            pl.BlockSpec((Tt, B, I), lambda t: (t, 0, 0)),        # x tile
            pl.BlockSpec((B, 4 * Hp), lambda t: (0, 0)),          # rec gates
            pl.BlockSpec((B, Hp), lambda t: (0, 0)),              # c0
            pl.BlockSpec((B, Hp), lambda t: (0, 0)),              # noise
            pl.BlockSpec((I, 4 * Hp), lambda t: (0, 0)),          # W_ih^T
        ],
        out_specs=pl.BlockSpec((Tt, B, Hp), lambda t: (t, 0, 0)),
        compiler_params=pltpu.CompilerParams(
            dimension_semantics=("parallel",),
            vmem_limit_bytes=vmem_limit),
    )(x_k, rec_p, c0_p, noise_p, w_ih_t)

    outputs = out[:T, :, :H]                      # strip T / H padding
    h_last = outputs[T - 1]

    # Last-step cell state: one tiny (B, 4H) cell eval in plain JAX (exactly
    # the reference recurrence, using the hoisted `rec` term).
    gates_last = jnp.asarray(x[T - 1], f32) @ w_ih_f.T + rec
    i_l = jax.nn.sigmoid(gates_last[:, 0 * H:1 * H])
    f_l = jax.nn.sigmoid(gates_last[:, 1 * H:2 * H])
    g_l = jnp.tanh(gates_last[:, 2 * H:3 * H])
    c_last = (f_l * jnp.asarray(c0, f32) + i_l * g_l
              + jnp.asarray(noise, f32)).astype(out_dtype)
    return outputs, (h_last, c_last)


def _reference(x, h0, c0, w_ih, w_hh, b_ih, b_hh, noise):
    """Pure-JAX reference matching the PyTorch loop semantics."""
    H = h0.shape[-1]
    outs = []
    for t in range(x.shape[0]):
        gates = x[t] @ w_ih.T + b_ih + h0 @ w_hh.T + b_hh
        i = jax.nn.sigmoid(gates[:, 0 * H:1 * H])
        f = jax.nn.sigmoid(gates[:, 1 * H:2 * H])
        g = jnp.tanh(gates[:, 2 * H:3 * H])
        o = jax.nn.sigmoid(gates[:, 3 * H:4 * H])
        c = f * c0 + i * g + noise
        h = o * jnp.tanh(c)
        outs.append(h)
    return jnp.stack(outs), (h, c)


if __name__ == "__main__":
    T, B, I, H = 8, 2, 32, 32
    key = jax.random.PRNGKey(0)
    ks = jax.random.split(key, 8)

    x = jax.random.normal(ks[0], (T, B, I), jnp.float32)
    h0 = jax.random.normal(ks[1], (B, H), jnp.float32)
    c0 = jax.random.normal(ks[2], (B, H), jnp.float32)
    noise = 0.1 * jax.random.normal(ks[3], (B, H), jnp.float32)

    w_ih = 0.1 * jax.random.normal(ks[4], (4 * H, I), jnp.float32)
    w_hh = 0.1 * jax.random.normal(ks[5], (4 * H, H), jnp.float32)
    b_ih = 0.1 * jax.random.normal(ks[6], (4 * H,), jnp.float32)
    b_hh = 0.1 * jax.random.normal(ks[7], (4 * H,), jnp.float32)

    # Exact (f32) path.
    outputs, (h, c) = lstm_layer_forward(x, h0, c0, w_ih, w_hh, b_ih, b_hh, noise)
    jax.block_until_ready((outputs, h, c))

    ref_out, (ref_h, ref_c) = _reference(x, h0, c0, w_ih, w_hh, b_ih, b_hh, noise)
    assert outputs.shape == ref_out.shape
    assert jnp.allclose(outputs, ref_out, atol=1e-4), "outputs mismatch"
    assert jnp.allclose(h, ref_h, atol=1e-4), "h mismatch"
    assert jnp.allclose(c, ref_c, atol=1e-4), "c mismatch"

    # bf16 MXU-operand path (recommended default on v6e/v7x); looser tolerance.
    out_bf, (h_bf, c_bf) = lstm_layer_forward(
        x, h0, c0, w_ih, w_hh, b_ih, b_hh, noise, mxu_dtype=jnp.bfloat16)
    jax.block_until_ready((out_bf, h_bf, c_bf))
    assert jnp.allclose(out_bf, ref_out, atol=5e-2, rtol=5e-2), "bf16 mismatch"

    print("KERNEL_OK")
</pallas_src>

<mosaic_0001>
module attributes {stable_mosaic.version = 11 : i64} {
  func.func @_lstm_layer_kernel(%arg0: i32, %arg1: memref<8x2x32xf32, #tpu.memory_space<vmem>>, %arg2: memref<2x512xf32, #tpu.memory_space<vmem>>, %arg3: memref<2x128xf32, #tpu.memory_space<vmem>>, %arg4: memref<2x128xf32, #tpu.memory_space<vmem>>, %arg5: memref<32x512xf32, #tpu.memory_space<vmem>>, %arg6: memref<8x2x128xf32, #tpu.memory_space<vmem>>) attributes {dimension_semantics = [#tpu.dimension_semantics<parallel>], iteration_bounds = array<i64: 1>, scalar_prefetch = 0 : i64, scratch_operands = 0 : i64, tpu.core_type = #tpu.core_type<tc>, window_params = [{transform_indices = @transform_0, window_bounds = array<i64: 8, 2, 32>}, {pipeline_mode = #tpu.pipeline_mode<synchronous>, transform_indices = @transform_1, window_bounds = array<i64: 2, 512>}, {pipeline_mode = #tpu.pipeline_mode<synchronous>, transform_indices = @transform_2, window_bounds = array<i64: 2, 128>}, {pipeline_mode = #tpu.pipeline_mode<synchronous>, transform_indices = @transform_3, window_bounds = array<i64: 2, 128>}, {pipeline_mode = #tpu.pipeline_mode<synchronous>, transform_indices = @transform_4, window_bounds = array<i64: 32, 512>}, {transform_indices = @transform_5, window_bounds = array<i64: 8, 2, 128>}]} {
    %c0 = arith.constant 0 : index
    %c0_0 = arith.constant 0 : index
    %0 = vector.load %arg5[%c0, %c0_0] : memref<32x512xf32, #tpu.memory_space<vmem>>, vector<32x512xf32>
    %c0_1 = arith.constant 0 : index
    %c0_2 = arith.constant 0 : index
    %c0_3 = arith.constant 0 : index
    %1 = vector.load %arg1[%c0_1, %c0_2, %c0_3] : memref<8x2x32xf32, #tpu.memory_space<vmem>>, vector<8x1x32xf32>
    %2 = vector.shape_cast %1 : vector<8x1x32xf32> to vector<8x32xf32>
    %cst = arith.constant dense<0.000000e+00> : vector<8x512xf32>
    %3 = tpu.matmul %2, %0, %cst {dimension_numbers = #tpu.dot_dimension_numbers<[1], [0], [0], [1], [0, 0, 1, 1], [], []>} : vector<8x32xf32>, vector<32x512xf32>, vector<8x512xf32> -> vector<8x512xf32>
    %c0_4 = arith.constant 0 : index
    %c0_5 = arith.constant 0 : index
    %4 = vector.load %arg2[%c0_4, %c0_5] : memref<2x512xf32, #tpu.memory_space<vmem>>, vector<1x512xf32>
    %5 = vector.broadcast %4 : vector<1x512xf32> to vector<8x512xf32>
    %6 = arith.addf %3, %5 : vector<8x512xf32>
    %7 = vector.extract_strided_slice %6 {offsets = [0, 0], sizes = [8, 128], strides = [1, 1]} : vector<8x512xf32> to vector<8x128xf32>
    %cst_6 = arith.constant 5.000000e-01 : f32
    %8 = vector.broadcast %cst_6 : f32 to vector<8x128xf32>
    %9 = arith.mulf %8, %7 : vector<8x128xf32>
    %10 = math.tanh %9 : vector<8x128xf32>
    %cst_7 = arith.constant 5.000000e-01 : f32
    %11 = vector.broadcast %cst_7 : f32 to vector<8x128xf32>
    %12 = arith.mulf %11, %10 : vector<8x128xf32>
    %cst_8 = arith.constant 5.000000e-01 : f32
    %13 = vector.broadcast %cst_8 : f32 to vector<8x128xf32>
    %14 = arith.addf %12, %13 : vector<8x128xf32>
    %15 = vector.extract_strided_slice %6 {offsets = [0, 128], sizes = [8, 128], strides = [1, 1]} : vector<8x512xf32> to vector<8x128xf32>
    %cst_9 = arith.constant 5.000000e-01 : f32
    %16 = vector.broadcast %cst_9 : f32 to vector<8x128xf32>
    %17 = arith.mulf %16, %15 : vector<8x128xf32>
    %18 = math.tanh %17 : vector<8x128xf32>
    %cst_10 = arith.constant 5.000000e-01 : f32
    %19 = vector.broadcast %cst_10 : f32 to vector<8x128xf32>
    %20 = arith.mulf %19, %18 : vector<8x128xf32>
    %cst_11 = arith.constant 5.000000e-01 : f32
    %21 = vector.broadcast %cst_11 : f32 to vector<8x128xf32>
    %22 = arith.addf %20, %21 : vector<8x128xf32>
    %23 = vector.extract_strided_slice %6 {offsets = [0, 256], sizes = [8, 128], strides = [1, 1]} : vector<8x512xf32> to vector<8x128xf32>
    %24 = math.tanh %23 : vector<8x128xf32>
    %25 = vector.extract_strided_slice %6 {offsets = [0, 384], sizes = [8, 128], strides = [1, 1]} : vector<8x512xf32> to vector<8x128xf32>
    %cst_12 = arith.constant 5.000000e-01 : f32
    %26 = vector.broadcast %cst_12 : f32 to vector<8x128xf32>
    %27 = arith.mulf %26, %25 : vector<8x128xf32>
    %28 = math.tanh %27 : vector<8x128xf32>
    %cst_13 = arith.constant 5.000000e-01 : f32
    %29 = vector.broadcast %cst_13 : f32 to vector<8x128xf32>
    %30 = arith.mulf %29, %28 : vector<8x128xf32>
    %cst_14 = arith.constant 5.000000e-01 : f32
    %31 = vector.broadcast %cst_14 : f32 to vector<8x128xf32>
    %32 = arith.addf %30, %31 : vector<8x128xf32>
    %c0_15 = arith.constant 0 : index
    %c0_16 = arith.constant 0 : index
    %33 = vector.load %arg3[%c0_15, %c0_16] : memref<2x128xf32, #tpu.memory_space<vmem>>, vector<1x128xf32>
    %34 = vector.broadcast %33 : vector<1x128xf32> to vector<8x128xf32>
    %35 = arith.mulf %22, %34 : vector<8x128xf32>
    %36 = arith.mulf %14, %24 : vector<8x128xf32>
    %37 = arith.addf %35, %36 : vector<8x128xf32>
    %c0_17 = arith.constant 0 : index
    %c0_18 = arith.constant 0 : index
    %38 = vector.load %arg4[%c0_17, %c0_18] : memref<2x128xf32, #tpu.memory_space<vmem>>, vector<1x128xf32>
    %39 = vector.broadcast %38 : vector<1x128xf32> to vector<8x128xf32>
    %40 = arith.addf %37, %39 : vector<8x128xf32>
    %41 = math.tanh %40 : vector<8x128xf32>
    %42 = arith.mulf %32, %41 : vector<8x128xf32>
    %c0_19 = arith.constant 0 : index
    %c0_20 = arith.constant 0 : index
    %c0_21 = arith.constant 0 : index
    %43 = vector.load %arg6[%c0_19, %c0_20, %c0_21] : memref<8x2x128xf32, #tpu.memory_space<vmem>>, vector<8x1x128xf32>
    %44 = vector.shape_cast %43 : vector<8x1x128xf32> to vector<8x128xf32>
    %45 = vector.shape_cast %42 : vector<8x128xf32> to vector<8x1x128xf32>
    tpu.vector_store %arg6[%c0_19, %c0_20, %c0_21], %45 {strides = array<i32>} : memref<8x2x128xf32, #tpu.memory_space<vmem>>, vector<8x1x128xf32>,
    %c0_22 = arith.constant 0 : index
    %c1 = arith.constant 1 : index
    %c0_23 = arith.constant 0 : index
    %46 = vector.load %arg1[%c0_22, %c1, %c0_23] : memref<8x2x32xf32, #tpu.memory_space<vmem>>, vector<8x1x32xf32>
    %47 = vector.shape_cast %46 : vector<8x1x32xf32> to vector<8x32xf32>
    %cst_24 = arith.constant dense<0.000000e+00> : vector<8x512xf32>
    %48 = tpu.matmul %47, %0, %cst_24 {dimension_numbers = #tpu.dot_dimension_numbers<[1], [0], [0], [1], [0, 0, 1, 1], [], []>} : vector<8x32xf32>, vector<32x512xf32>, vector<8x512xf32> -> vector<8x512xf32>
    %c1_25 = arith.constant 1 : index
    %c0_26 = arith.constant 0 : index
    %49 = vector.load %arg2[%c1_25, %c0_26] : memref<2x512xf32, #tpu.memory_space<vmem>>, vector<1x512xf32>
    %50 = vector.broadcast %49 : vector<1x512xf32> to vector<8x512xf32>
    %51 = arith.addf %48, %50 : vector<8x512xf32>
    %52 = vector.extract_strided_slice %51 {offsets = [0, 0], sizes = [8, 128], strides = [1, 1]} : vector<8x512xf32> to vector<8x128xf32>
    %cst_27 = arith.constant 5.000000e-01 : f32
    %53 = vector.broadcast %cst_27 : f32 to vector<8x128xf32>
    %54 = arith.mulf %53, %52 : vector<8x128xf32>
    %55 = math.tanh %54 : vector<8x128xf32>
    %cst_28 = arith.constant 5.000000e-01 : f32
    %56 = vector.broadcast %cst_28 : f32 to vector<8x128xf32>
    %57 = arith.mulf %56, %55 : vector<8x128xf32>
    %cst_29 = arith.constant 5.000000e-01 : f32
    %58 = vector.broadcast %cst_29 : f32 to vector<8x128xf32>
    %59 = arith.addf %57, %58 : vector<8x128xf32>
    %60 = vector.extract_strided_slice %51 {offsets = [0, 128], sizes = [8, 128], strides = [1, 1]} : vector<8x512xf32> to vector<8x128xf32>
    %cst_30 = arith.constant 5.000000e-01 : f32
    %61 = vector.broadcast %cst_30 : f32 to vector<8x128xf32>
    %62 = arith.mulf %61, %60 : vector<8x128xf32>
    %63 = math.tanh %62 : vector<8x128xf32>
    %cst_31 = arith.constant 5.000000e-01 : f32
    %64 = vector.broadcast %cst_31 : f32 to vector<8x128xf32>
    %65 = arith.mulf %64, %63 : vector<8x128xf32>
    %cst_32 = arith.constant 5.000000e-01 : f32
    %66 = vector.broadcast %cst_32 : f32 to vector<8x128xf32>
    %67 = arith.addf %65, %66 : vector<8x128xf32>
    %68 = vector.extract_strided_slice %51 {offsets = [0, 256], sizes = [8, 128], strides = [1, 1]} : vector<8x512xf32> to vector<8x128xf32>
    %69 = math.tanh %68 : vector<8x128xf32>
    %70 = vector.extract_strided_slice %51 {offsets = [0, 384], sizes = [8, 128], strides = [1, 1]} : vector<8x512xf32> to vector<8x128xf32>
    %cst_33 = arith.constant 5.000000e-01 : f32
    %71 = vector.broadcast %cst_33 : f32 to vector<8x128xf32>
    %72 = arith.mulf %71, %70 : vector<8x128xf32>
    %73 = math.tanh %72 : vector<8x128xf32>
    %cst_34 = arith.constant 5.000000e-01 : f32
    %74 = vector.broadcast %cst_34 : f32 to vector<8x128xf32>
    %75 = arith.mulf %74, %73 : vector<8x128xf32>
    %cst_35 = arith.constant 5.000000e-01 : f32
    %76 = vector.broadcast %cst_35 : f32 to vector<8x128xf32>
    %77 = arith.addf %75, %76 : vector<8x128xf32>
    %c1_36 = arith.constant 1 : index
    %c0_37 = arith.constant 0 : index
    %78 = vector.load %arg3[%c1_36, %c0_37] : memref<2x128xf32, #tpu.memory_space<vmem>>, vector<1x128xf32>
    %79 = vector.broadcast %78 : vector<1x128xf32> to vector<8x128xf32>
    %80 = arith.mulf %67, %79 : vector<8x128xf32>
    %81 = arith.mulf %59, %69 : vector<8x128xf32>
    %82 = arith.addf %80, %81 : vector<8x128xf32>
    %c1_38 = arith.constant 1 : index
    %c0_39 = arith.constant 0 : index
    %83 = vector.load %arg4[%c1_38, %c0_39] : memref<2x128xf32, #tpu.memory_space<vmem>>, vector<1x128xf32>
    %84 = vector.broadcast %83 : vector<1x128xf32> to vector<8x128xf32>
    %85 = arith.addf %82, %84 : vector<8x128xf32>
    %86 = math.tanh %85 : vector<8x128xf32>
    %87 = arith.mulf %77, %86 : vector<8x128xf32>
    %c0_40 = arith.constant 0 : index
    %c1_41 = arith.constant 1 : index
    %c0_42 = arith.constant 0 : index
    %88 = vector.load %arg6[%c0_40, %c1_41, %c0_42] : memref<8x2x128xf32, #tpu.memory_space<vmem>>, vector<8x1x128xf32>
    %89 = vector.shape_cast %88 : vector<8x1x128xf32> to vector<8x128xf32>
    %90 = vector.shape_cast %87 : vector<8x128xf32> to vector<8x1x128xf32>
    tpu.vector_store %arg6[%c0_40, %c1_41, %c0_42], %90 {strides = array<i32>} : memref<8x2x128xf32, #tpu.memory_space<vmem>>, vector<8x1x128xf32>,
    return
  }
  func.func @transform_0(%arg0: i32) -> (i32, i32, i32) {
    %c0_i32 = arith.constant 0 : i32
    %c0_i32_0 = arith.constant 0 : i32
    %c0_i32_1 = arith.constant 0 : i32
    return %arg0, %c0_i32, %c0_i32_0 : i32, i32, i32
  }
  func.func @transform_1(%arg0: i32) -> (i32, i32) {
    %c0_i32 = arith.constant 0 : i32
    %c0_i32_0 = arith.constant 0 : i32
    %c0_i32_1 = arith.constant 0 : i32
    return %c0_i32, %c0_i32_0 : i32, i32
  }
  func.func @transform_2(%arg0: i32) -> (i32, i32) {
    %c0_i32 = arith.constant 0 : i32
    %c0_i32_0 = arith.constant 0 : i32
    %c0_i32_1 = arith.constant 0 : i32
    return %c0_i32, %c0_i32_0 : i32, i32
  }
  func.func @transform_3(%arg0: i32) -> (i32, i32) {
    %c0_i32 = arith.constant 0 : i32
    %c0_i32_0 = arith.constant 0 : i32
    %c0_i32_1 = arith.constant 0 : i32
    return %c0_i32, %c0_i32_0 : i32, i32
  }
  func.func @transform_4(%arg0: i32) -> (i32, i32) {
    %c0_i32 = arith.constant 0 : i32
    %c0_i32_0 = arith.constant 0 : i32
    %c0_i32_1 = arith.constant 0 : i32
    return %c0_i32, %c0_i32_0 : i32, i32
  }
  func.func @transform_5(%arg0: i32) -> (i32, i32, i32) {
    %c0_i32 = arith.constant 0 : i32
    %c0_i32_0 = arith.constant 0 : i32
    %c0_i32_1 = arith.constant 0 : i32
    return %arg0, %c0_i32, %c0_i32_0 : i32, i32, i32
  }
}

</mosaic_0001>

<bundles_post_ra>
// kernel: tpu_custom_call.1
= control target key start
LH: loop header
LB: loop body
LE: loop exit
PB: predicated region body
PF: predicated region fallthrough
CT: control target
= control target key end

     0   :  { %10 = vsyncpa [#allocation3], 0  ;;  %s1010_s0 = inlined_call_operand.hbm [shape: f32[8,2,32], index: 0, kind: input, shape index: {}]   ;;  %s1011_s1 = inlined_call_operand.hbm [shape: f32[2,512], index: 1, kind: input, shape index: {}]   ;;  %s1012_s2 = inlined_call_operand.vmem [shape: f32[2,128], index: 2, kind: input, shape index: {}]   ;;  %s1013_s3 = inlined_call_operand.vmem [shape: f32[2,128], index: 3, kind: input, shape index: {}]   ;;  %s1014_s4 = inlined_call_operand.hbm [shape: f32[32,512], index: 4, kind: input, shape index: {}]   ;;  %s1015_s5 = inlined_call_operand.hbm [shape: f32[8,2,128], index: 5, kind: output, shape index: {}]  }
   0x1   :  { %11 = vsyncpa [#allocation6], 0 }
   0x2   :  { %12 = vsyncpa [#allocation4], 0  ;;  %s856_s18 = smov [#allocation5]   ;;  %s857_s20 = smov [#allocation2]  }
   0x3   :  { %s31_s19 = sshll.u32 %s856_s18, 4  ;;  %s18_s21 = sshll.u32 %s857_s20, 4  ;;  %s32_s19 = int_to_ptr.vmem [resolvable:$true] %s31_s19  ;;  %s895_s21 = int_to_ptr.vmem [resolvable:$true] %s18_s21 }
   0x4   :  { %s762_s24 = scalar_lea.hbm %s1011_s1, 128 }
   0x5   :  { %p763_p0 = scmp.ne.s32.totalorder %s1011_s1, %s762_s24  ;;  %p766_p1 = scmp.lt.u32.totalorder %s762_s24, %s1011_s1 }
   0x7   :  { %p768_p2 = pnand %p766_p1, %p763_p0 }
   0x9   :  { %771 = shalt.err (!%p768_p2)
}
   0xa   :  { %s772_s29 = scalar_lea.vmem %s32_s19, 128  ;;  %p777_p4 = scmp.lt.s32.totalorder %s32_s19, %s32_s19 }
   0xb   :  { %p773_p3 = scmp.ne.s32.totalorder %s32_s19, %s772_s29  ;;  %p778_p5 = scmp.lt.s32.totalorder %s772_s29, %s772_s29 }
   0xd   :  { %p779_p6 = por %p778_p5, %p777_p4 }
   0xf   :  { %p780_p7 = pnand %p779_p6, %p773_p3 }
  0x11   :  { %783 = shalt.err (!%p780_p7)
}
  0x12   :  { %34 = dma.hbm_to_vmem [thread:$0]  %s1011_s1, 128, %s32_s19, [#allocation6]  }
  0x13   :  { %s784_s9 = scalar_lea.hbm %s1010_s0, 256 }
  0x14   :  { %p785_p8 = scmp.ne.s32.totalorder %s1010_s0, %s784_s9  ;;  %p788_p9 = scmp.lt.u32.totalorder %s784_s9, %s1010_s0 }
  0x16   :  { %p790_p10 = pnand %p788_p9, %p785_p8 }
  0x18   :  { %793 = shalt.err (!%p790_p10)
}
  0x19   :  { %s794_s14 = scalar_lea.vmem %s895_s21, 256  ;;  %p799_p12 = scmp.lt.s32.totalorder %s895_s21, %s895_s21 }
  0x1a   :  { %p795_p11 = scmp.ne.s32.totalorder %s895_s21, %s794_s14  ;;  %p800_p13 = scmp.lt.s32.totalorder %s794_s14, %s794_s14 }
  0x1c   :  { %p801_p0 = por %p800_p13, %p799_p12 }
  0x1e   :  { %p802_p1 = pnand %p801_p0, %p795_p11 }
  0x20   :  { %805 = shalt.err (!%p802_p1)
}
  0x21   :  { %s858_s1 = smov 32   ;;  %s859_s15 = smov 2  }
  0x22   :  { %24 = dma.hbm_to_vmem [thread:$0]  %s1010_s0, 256, %s895_s21, [#allocation3], %s858_s1, %s858_s1, %s859_s15  }
  0x23   :  { %s860_s18 = smov [#allocation7]   ;;  %s806_s23 = scalar_lea.hbm %s1014_s4, 2048 }
  0x24   :  { %s44_s19 = sshll.u32 %s860_s18, 4  ;;  %p807_p2 = scmp.ne.s32.totalorder %s1014_s4, %s806_s23  ;;  %s45_s19 = int_to_ptr.vmem [resolvable:$true] %s44_s19 }
  0x25   :  { %p810_p3 = scmp.lt.u32.totalorder %s806_s23, %s1014_s4 }
  0x27   :  { %p812_p4 = pnand %p810_p3, %p807_p2 }
  0x29   :  { %815 = shalt.err (!%p812_p4)
}
  0x2a   :  { %s816_s28 = scalar_lea.vmem %s45_s19, 2048  ;;  %p821_p6 = scmp.lt.s32.totalorder %s45_s19, %s45_s19 }
  0x2b   :  { %p817_p5 = scmp.ne.s32.totalorder %s45_s19, %s816_s28  ;;  %p822_p7 = scmp.lt.s32.totalorder %s816_s28, %s816_s28 }
  0x2d   :  { %p823_p8 = por %p822_p7, %p821_p6 }
  0x2f   :  { %p824_p9 = pnand %p823_p8, %p817_p5 }
  0x31   :  { %827 = shalt.err (!%p824_p9)
}
  0x32   :  { %s861_s0 = smov 512  }
  0x33   :  { %50 = dma.hbm_to_vmem [thread:$0]  %s1014_s4, 2048, %s45_s19, [#allocation6], %s861_s0, %s861_s0, %s858_s1  }
  0x34   :  { %850 = dma.done.wait [#allocation3], 256  }
  0x35   :  { %851 = vsyncadd [#allocation3], 4294967040 }
  0x36   :  { %852 = dma.done.wait [#allocation6], 2176  }
  0x37   :  { %853 = vsyncadd [#allocation6], 4294965120  ;;  %v862_v0 = vmov 0.0   ;;  %v61_v1 = vld [vmem:[#allocation7 + $0x8] sm:$0xff]  ;;  %v60_v3 = vld [vmem:[#allocation7] sm:$0xff]  ;;  %vm115_vm0 = vcmask 1041409  }
  0x38   :  { %202 = vmatprep.mubr.f32.mxu0 %v862_v0  ;;  %273 = vmatprep.mubr.f32.mxu1 %v862_v0  ;;  %v65_v2 = vld [vmem:[#allocation7 + $0x28] sm:$0xff]  ;;  %v64_v5 = vld [vmem:[#allocation7 + $0x20] sm:$0xff]  ;;  %v63_v12 = vld [vmem:[#allocation7 + $0x18] sm:$0xff]  ;;  %vm118_vm1 = vcmask 1042434   ;;  %vm121_vm2 = vcmask 1043459   ;;  %vm124_vm3 = vcmask 1044484  }
  0x39   :  { %v701_v4 = vpack.c.bf16 %v65_v2, %v61_v1  ;;  %v69_v6 = vld [vmem:[#allocation7 + $0x48] sm:$0xff]  ;;  %v944_v8 = vpack.c.bf16 %v64_v5, %v60_v3  ;;  %v68_v10 = vld [vmem:[#allocation7 + $0x40] sm:$0xff]  ;;  %v67_v13 = vld [vmem:[#allocation7 + $0x38] sm:$0xff]  ;;  %vm127_vm4 = vcmask 1045509   ;;  %vm130_vm5 = vcmask 1046534  }
  0x3a   :  { %v73_v7 = vld [vmem:[#allocation7 + $0x68] sm:$0xff]  ;;  %v72_v11 = vld [vmem:[#allocation7 + $0x60] sm:$0xff]  ;;  %v62_v14 = vld [vmem:[#allocation7 + $0x10] sm:$0xff]  ;;  %v709_v17 = vpack.c.bf16 %v67_v13, %v63_v12  ;;  %vm133_vm6 = vcmask 1047559   ;;  %vm135_vm7 = vcmask 261120  }
  0x3b   :  { %v946_v9 = vpack.c.bf16 %v73_v7, %v69_v6  ;;  %702 = vmatprep.subr.bf16.mxu0 %v701_v4  ;;  %v66_v15 = vld [vmem:[#allocation7 + $0x30] sm:$0xff]  ;;  %v949_v16 = vpack.c.bf16 %v72_v11, %v68_v10  ;;  %v76_v19 = vld [vmem:[#allocation2] sm:$0x1]  ;;  %v77_v20 = vld [vmem:[#allocation2 + $0x2] sm:$0x1]  ;;  %v86_v6 = vlaneseq }
  0x3c   :  { %704 = vmatpush1.bf16.msra.mxu0 %v944_v8  ;;  %v711_v18 = vpack.c.bf16 %v66_v15, %v62_v14  ;;  %v78_v21 = vld [vmem:[#allocation2 + $0x4] sm:$0x1]  ;;  %v79_v22 = vld [vmem:[#allocation2 + $0x6] sm:$0x1]  ;;  %v80_v23 = vld [vmem:[#allocation2 + $0x8] sm:$0x1]  ;;  %710 = vmatprep.subr.bf16.mxu1 %v709_v17 }
  0x3d   :  { %706 = vmatprep.subr.bf16.mxu0 %v946_v9  ;;  %v81_v24 = vld [vmem:[#allocation2 + $0xa] sm:$0x1]  ;;  %v82_v25 = vld [vmem:[#allocation2 + $0xc] sm:$0x1]  ;;  %v83_v26 = vld [vmem:[#allocation2 + $0xe] sm:$0x1] }
  0x3e   :  { %v114_v27 = vrot.slane %v77_v20, 7  ;;  %v117_v28 = vrot.slane %v78_v21, 6  ;;  %712 = vmatpush1.bf16.msra.mxu1 %v711_v18  ;;  %v120_v29 = vrot.slane %v79_v22, 5  ;;  %v123_v30 = vrot.slane %v80_v23, 4  ;;  %v71_v32 = vld [vmem:[#allocation7 + $0x58] sm:$0xff]  ;;  %v70_v38 = vld [vmem:[#allocation7 + $0x50] sm:$0xff] }
  0x3f   :  { %v126_v31 = vrot.slane %v81_v24, 3  ;;  %v75_v33 = vld [vmem:[#allocation7 + $0x78] sm:$0xff]  ;;  %v129_v35 = vrot.slane %v82_v25, 2  ;;  %v132_v36 = vrot.slane %v83_v26, 1  ;;  %v74_v39 = vld [vmem:[#allocation7 + $0x70] sm:$0xff]  ;;  %v976_v7 = vshrl.u32 %v86_v6, 7 }
  0x40   :  { %708 = vmatpush1.bf16.msra.mxu0 %v949_v16  ;;  %v116_v34 = vsel %vm115_vm0, %v114_v27, %v76_v19  ;;  %v713_v37 = vpack.c.bf16 %v75_v33, %v71_v32  ;;  %v715_v41 = vpack.c.bf16 %v74_v39, %v70_v38  ;;  %v376_v42 = vld [vmem:[#allocation2 + $0x3] sm:$0x1]  ;;  %v377_v43 = vld [vmem:[#allocation2 + $0x5] sm:$0x1]  ;;  %v378_v44 = vld [vmem:[#allocation2 + $0x7] sm:$0x1] }
  0x41   :  { %v119_v40 = vsel %vm118_vm1, %v117_v28, %v116_v34  ;;  %718 = vmatprep.subr.bf16.mxu0 %v701_v4  ;;  %v375_v46 = vld [vmem:[#allocation2 + $0x1] sm:$0x1]  ;;  %v379_v47 = vld [vmem:[#allocation2 + $0x9] sm:$0x1]  ;;  %v380_v48 = vld [vmem:[#allocation2 + $0xb] sm:$0x1] }
  0x42   :  { %v122_v45 = vsel %vm121_vm2, %v120_v29, %v119_v40  ;;  %714 = vmatprep.subr.bf16.mxu1 %v713_v37  ;;  %v381_v50 = vld [vmem:[#allocation2 + $0xd] sm:$0x1]  ;;  %v414_v51 = vrot.slane %v376_v42, 7  ;;  %v416_v52 = vrot.slane %v377_v43, 6  ;;  %v418_v53 = vrot.slane %v378_v44, 5 }
  0x43   :  { %v125_v49 = vsel %vm124_vm3, %v123_v30, %v122_v45  ;;  %716 = vmatpush1.bf16.msra.mxu1 %v715_v41  ;;  %v420_v55 = vrot.slane %v379_v47, 4  ;;  %v382_v57 = vld [vmem:[#allocation2 + $0xf] sm:$0x1]  ;;  %v422_v59 = vrot.slane %v380_v48, 3  ;;  %v424_v62 = vrot.slane %v381_v50, 2 }
  0x44   :  { %v128_v54 = vsel %vm127_vm4, %v126_v31, %v125_v49  ;;  %726 = vmatprep.subr.bf16.mxu1 %v709_v17  ;;  %v415_v58 = vsel %vm115_vm0, %v414_v51, %v375_v46  ;;  %v426_v2 = vrot.slane %v382_v57, 1  ;;  %v92_v10 = vsub.s32 1, %v976_v7  ;;  %v384_v20 = vld [vmem:[#allocation5 + $0x1] ss:$2 sm:$0xf] }
  0x45   :  { %v131_v56 = vsel %vm130_vm5, %v129_v35, %v128_v54  ;;  %v417_v61 = vsel %vm118_vm1, %v416_v52, %v415_v58  ;;  %v96_v11 = vsub.s32 2, %v976_v7  ;;  %v100_v23 = vsub.s32 3, %v976_v7  ;;  %v687_v47 = vld [vmem:[%s1012_s2] ss:$0 sm:$0xff]  ;;  %v696_v6 = vld [vmem:[%s1013_s3 + $0x1] ss:$0 sm:$0xff] }
  0x46   :  { %v134_v60 = vsel %vm133_vm6, %v132_v36, %v131_v56  ;;  %v419_v63 = vsel %vm121_vm2, %v418_v53, %v417_v61  ;;  %v393_v26 = vrot.slane %v384_v20, %v92_v10  ;;  %v688_v52 = vld [vmem:[%s1013_s3] ss:$0 sm:$0xff] }
  0x47   :  { %685 = vmatmul.mubr.msk.f32.vlgmr.msra.gmra.mrb[0].mxu0 %vm135_vm7, %v134_v60  ;;  %686 = vmatmul.mubr.msk.f32.vlgmr.msra.gmra.mrb[0].mxu1 %vm135_vm7, %v134_v60  ;;  %v421_v1 = vsel %vm124_vm3, %v420_v55, %v419_v63  ;;  %v397_v28 = vrot.slane %v384_v20, %v96_v11  ;;  %v401_v39 = vrot.slane %v384_v20, %v100_v23 }
  0x48   :  { %720 = vmatpush1.bf16.msra.mxu0 %v944_v8  ;;  %494 = vmatprep.mubr.f32.mxu0 %v862_v0  ;;  %v423_v3 = vsel %vm127_vm4, %v422_v59, %v421_v1  ;;  %v88_v8 = vsub.s32 0, %v976_v7  ;;  %v863_v1 = vmov 1966171168  }
  0x49   :  { %722 = vmatprep.subr.bf16.mxu0 %v946_v9  ;;  %728 = vmatpush1.bf16.msra.mxu1 %v711_v18  ;;  %v425_v4 = vsel %vm130_vm5, %v424_v62, %v423_v3  ;;  %v84_v9 = vld [vmem:[#allocation5] ss:$2 sm:$0xf]  ;;  %v695_v62 = vld [vmem:[%s1012_s2 + $0x1] ss:$0 sm:$0xff]  ;;  %s864_s2 = smov [#allocation8]  }
  0x4a   :  { %730 = vmatprep.subr.bf16.mxu1 %v713_v37  ;;  %565 = vmatprep.mubr.f32.mxu1 %v862_v0  ;;  %v427_v5 = vsel %vm133_vm6, %v426_v2, %v425_v4  ;;  %v89_v0 = vrot.slane %v84_v9, %v88_v8  ;;  %v93_v12 = vrot.slane %v84_v9, %v92_v10  ;;  %v312_v2 = vunpack.c.l.s4 %v863_v1  ;;  %s672_s3 = sshll.u32 %s864_s2, 4  ;;  %s673_s3 = int_to_ptr.vmem [resolvable:$true] %s672_s3 }
  0x4b   :  { %v97_v13 = vrot.slane %v84_v9, %v96_v11  ;;  %v389_v25 = vrot.slane %v384_v20, %v88_v8  ;;  %v101_v27 = vrot.slane %v84_v9, %v100_v23  ;;  %s828_s12 = scalar_lea.vmem %s673_s3, 256  ;;  %p833_p11 = scmp.lt.s32.totalorder %s673_s3, %s673_s3 }
  0x4c   :  { %724 = vmatpush1.bf16.msra.mxu0 %v949_v16  ;;  %v313_v9 = vunpack.c.0.s8 %v312_v2  ;;  %p829_p10 = scmp.ne.s32.totalorder %s673_s3, %s828_s12  ;;  %p834_p12 = scmp.lt.s32.totalorder %s828_s12, %s828_s12 }
  0x4d   :  { %732 = vmatpush1.bf16.msra.mxu1 %v715_v41 }
  0x4e   :  { %p835_p13 = por %p834_p12, %p833_p11 }
  0x4f   :  { %693 = vmatmul.mubr.msk.f32.vlgmr.msra.gmra.mrb[2].mxu0 %vm135_vm7, %v427_v5 }
  0x50   :  { %694 = vmatmul.mubr.msk.f32.vlgmr.msra.gmra.mrb[2].mxu1 %vm135_vm7, %v427_v5  ;;  %p836_p0 = pnand %p835_p13, %p829_p10 }
 0x11a   :  { %v204_v14 = vpop.f32.mrb[0].mxu0  ;;  %v275_v15 = vpop.f32.mrb[0].mxu1 }
 0x11b   :  { %v205_v16 = vadd.f32 %v204_v14, %v89_v0  ;;  %v206_v17 = vpop.f32.mrb[1].mxu0  ;;  %v277_v18 = vpop.f32.mrb[1].mxu1  ;;  %v276_v22 = vadd.f32 %v275_v15, %v97_v13 }
 0x11c   :  { %v207_v19 = vadd.f32 %v206_v17, %v93_v12  ;;  %v278_v35 = vadd.f32 %v277_v18, %v101_v27  ;;  %v316_v12 = vsub.s32 %v313_v9, %v976_v7 }
 0x11d   :  { %v280_v21 = vmul.f32 0.5, %v205_v16 }
 0x11e   :  { %v284_v24 = vmul.f32 0.5, %v207_v19  ;;  %v289_v41 = vmul.f32 0.5, %v278_v35 }
 0x11f   :  { %742 = vtanh.f32 %v280_v21 }
 0x120   :  { %744 = vtanh.f32 %v284_v24 }
 0x121   :  { %746 = vtanh.f32 %v276_v22 }
 0x122   :  { %v496_v29 = vpop.f32.mrb[2].mxu0 }
 0x123   :  { %v497_v30 = vadd.f32 %v496_v29, %v389_v25  ;;  %v498_v31 = vpop.f32.mrb[3].mxu0  ;;  %v567_v32 = vpop.f32.mrb[2].mxu1 }
 0x124   :  { %v499_v33 = vadd.f32 %v498_v31, %v393_v26  ;;  %v569_v34 = vpop.f32.mrb[3].mxu1  ;;  %v568_v37 = vadd.f32 %v567_v32, %v397_v28 }
 0x125   :  { %v572_v36 = vmul.f32 0.5, %v497_v30  ;;  %v570_v48 = vadd.f32 %v569_v34, %v401_v39 }
 0x126   :  { %v576_v38 = vmul.f32 0.5, %v499_v33 }
 0x127   :  { %748 = vtanh.f32 %v572_v36  ;;  %v581_v53 = vmul.f32 0.5, %v570_v48 }
 0x128   :  { %750 = vtanh.f32 %v576_v38 }
 0x129   :  { %v743_v40 = vpop.eup %742  ;;  %752 = vtanh.f32 %v568_v37 }
 0x12a   :  { %v745_v42 = vpop.eup %744  ;;  %v282_v43 = vmul.f32 0.5, %v743_v40  ;;  %754 = vtanh.f32 %v289_v41 }
 0x12b   :  { %v747_v44 = vpop.eup %746  ;;  %v286_v45 = vmul.f32 0.5, %v745_v42  ;;  %756 = vtanh.f32 %v581_v53 }
 0x12c   :  { %v283_v46 = vadd.f32 0.5, %v282_v43 }
 0x12d   :  { %v287_v49 = vadd.f32 0.5, %v286_v45 }
 0x12e   :  { %v299_v50 = vmul.f32 %v747_v44, %v283_v46 }
 0x12f   :  { %v298_v51 = vmul.f32 %v687_v47, %v287_v49 }
 0x131   :  { %v749_v54 = vpop.eup %748  ;;  %v300_v55 = vadd.f32 %v299_v50, %v298_v51 }
 0x132   :  { %v751_v56 = vpop.eup %750  ;;  %v574_v57 = vmul.f32 0.5, %v749_v54 }
 0x133   :  { %v753_v58 = vpop.eup %752  ;;  %v306_v59 = vadd.f32 %v688_v52, %v300_v55  ;;  %v578_v60 = vmul.f32 0.5, %v751_v56 }
 0x134   :  { %v575_v61 = vadd.f32 0.5, %v574_v57  ;;  %v755_v4 = vpop.eup %754 }
 0x135   :  { %758 = vtanh.f32 %v306_v59  ;;  %v579_v63 = vadd.f32 0.5, %v578_v60  ;;  %v291_v10 = vmul.f32 0.5, %v755_v4  ;;  %v757_v0 = vpop.eup %756 }
 0x136   :  { %v591_v3 = vmul.f32 %v753_v58, %v575_v61  ;;  %v583_v16 = vmul.f32 0.5, %v757_v0 }
 0x137   :  { %v590_v5 = vmul.f32 %v695_v62, %v579_v63  ;;  %v292_v13 = vadd.f32 0.5, %v291_v10 }
 0x138   :  { %v584_v22 = vadd.f32 0.5, %v583_v16 }
 0x139   :  { %v592_v8 = vadd.f32 %v591_v3, %v590_v5 }
 0x13b   :  { %v598_v11 = vadd.f32 %v696_v6, %v592_v8 }
 0x13d   :  { %760 = vtanh.f32 %v598_v11 }
 0x13f   :  { %v759_v14 = vpop.eup %758 }
 0x140   :  { %v308_v15 = vmul.f32 %v759_v14, %v292_v13 }
 0x142   :  { %v310_v17 = vcombine.high %v308_v15, %v308_v15  ;;  %v317_v18 = vrot.slane %v308_v15, %v316_v12 }
 0x144   :  { %v324_v19 = vrot.slane %v310_v17, %v316_v12  ;;  %v325_v20 = vcombine.high %v317_v18, %v317_v18  ;;  %v333_v21 = vrot.slane %v317_v18, %v316_v12  ;;  %689 = vst.sshfl [vmem:[#allocation8] sm:$0x1 pattern:$0x73625140] %v317_v18 }
 0x146   :  { %v326_v23 = vcombine.high %v324_v19, %v324_v19  ;;  %v340_v24 = vrot.slane %v324_v19, %v316_v12  ;;  %v347_v25 = vrot.slane %v325_v20, %v316_v12  ;;  %v355_v26 = vcombine.high %v333_v21, %v333_v21  ;;  %690 = vst.sshfl [vmem:[#allocation8 + $0x2] sm:$0x1 pattern:$0x73625140] %v325_v20 }
 0x147   :  { %691 = vst.sshfl [vmem:[#allocation8 + $0x8] sm:$0x1 pattern:$0x73625140] %v324_v19  ;;  %v761_v27 = vpop.eup %760 }
 0x148   :  { %v354_v28 = vrot.slane %v326_v23, %v316_v12  ;;  %v356_v7 = vcombine.high %v340_v24, %v340_v24  ;;  %v357_v29 = vcombine.high %v347_v25, %v347_v25  ;;  %369 = vst [vmem:[#allocation8 + $0x4] sm:$0x1] %v355_v26  ;;  %692 = vst.sshfl [vmem:[#allocation8 + $0xa] sm:$0x1 pattern:$0x73625140] %v326_v23 }
 0x149   :  { %v600_v30 = vmul.f32 %v761_v27, %v584_v22 }
 0x14a   :  { %v358_v31 = vcombine.high %v354_v28, %v354_v28  ;;  %370 = vst [vmem:[#allocation8 + $0x6] sm:$0x1] %v357_v29  ;;  %373 = vst [vmem:[#allocation8 + $0xc] sm:$0x1] %v356_v7 }
 0x14b   :  { %v602_v32 = vcombine.high %v600_v30, %v600_v30  ;;  %v609_v33 = vrot.slane %v600_v30, %v316_v12 }
 0x14c   :  { %374 = vst [vmem:[#allocation8 + $0xe] sm:$0x1] %v358_v31 }
 0x14d   :  { %v616_v34 = vrot.slane %v602_v32, %v316_v12  ;;  %v617_v35 = vcombine.high %v609_v33, %v609_v33  ;;  %v625_v36 = vrot.slane %v609_v33, %v316_v12  ;;  %697 = vst.sshfl [vmem:[#allocation8 + $0x1] sm:$0x1 pattern:$0x73625140] %v609_v33 }
 0x14f   :  { %v618_v37 = vcombine.high %v616_v34, %v616_v34  ;;  %v632_v38 = vrot.slane %v616_v34, %v316_v12  ;;  %v639_v39 = vrot.slane %v617_v35, %v316_v12  ;;  %v647_v40 = vcombine.high %v625_v36, %v625_v36  ;;  %698 = vst.sshfl [vmem:[#allocation8 + $0x3] sm:$0x1 pattern:$0x73625140] %v617_v35 }
 0x150   :  { %699 = vst.sshfl [vmem:[#allocation8 + $0x9] sm:$0x1 pattern:$0x73625140] %v616_v34 }
 0x151   :  { %v646_v41 = vrot.slane %v618_v37, %v316_v12  ;;  %v648_v42 = vcombine.high %v632_v38, %v632_v38  ;;  %v649_v43 = vcombine.high %v639_v39, %v639_v39  ;;  %661 = vst [vmem:[#allocation8 + $0x5] sm:$0x1] %v647_v40  ;;  %700 = vst.sshfl [vmem:[#allocation8 + $0xb] sm:$0x1 pattern:$0x73625140] %v618_v37 }
 0x153   :  { %v650_v44 = vcombine.high %v646_v41, %v646_v41  ;;  %662 = vst [vmem:[#allocation8 + $0x7] sm:$0x1] %v649_v43  ;;  %665 = vst [vmem:[#allocation8 + $0xd] sm:$0x1] %v648_v42 }
 0x155   :  { %666 = vst [vmem:[#allocation8 + $0xf] sm:$0x1] %v650_v44 }
 0x156   :  { %839 = shalt.err (!%p836_p0)
}
 0x157   :  { %s840_s16 = scalar_lea.hbm %s1015_s5, 256 }
 0x158   :  { %p841_p1 = scmp.ne.s32.totalorder %s1015_s5, %s840_s16  ;;  %p844_p2 = scmp.lt.u32.totalorder %s840_s16, %s1015_s5 }
 0x15a   :  { %p846_p3 = pnand %p844_p2, %p841_p1 }
 0x15c   :  { %849 = shalt.err (!%p846_p3)
}
 0x15d   :  { %678 = dma.vmem_to_hbm [thread:$0]  %s673_s3, 256, %s1015_s5, [#allocation4], %s858_s1, %s858_s1, %s859_s15  }
 0x15e   :  { %854 = dma.done.wait [#allocation4], 256  }
 0x15f   :  { %855 = vsyncadd [#allocation4], 4294967040 }
 0x160   :  { %682 = vsyncpa [#allocation3], 1 }
 0x161   :  { %683 = vsyncpa [#allocation6], 1 }
 0x162   :  { %684 = vsyncpa [#allocation4], 1 }

</bundles_post_ra>
